<compile_context>
chip_gen: v7x
topology: tpu7x:2x2x1
jax: 0.10.0
libtpu: 0.0.40
codegen_flags: <defaults>
</compile_context>

<pallas_src>
from functools import partial

import jax
import jax.numpy as jnp
from jax.experimental import pallas as pl
from jax.experimental.pallas import tpu as pltpu

BN_EPS = 1e-5          # torch.nn.BatchNorm1d default eps
MAX_TILE_N = 16384     # rows per grid step (~1.5 MiB/buffer of real data at T=24 f32)
STATS_SHARDS = 2       # leading "parallel" stats axis: one shard per TensorCore on v7x
_LANE = 128


def _round_up(x: int, m: int) -> int:
    return (x + m - 1) // m * m


def _vmem_config():
    """(vmem_limit_bytes, streaming-tile budget), sized per TPU generation."""
    try:
        cap = int(pltpu.get_tpu_info().vmem_capacity_bytes)
    except Exception:
        cap = 64 << 20                    # conservative default (v7x per-TC VMEM)
    cap = max(cap, 32 << 20)
    limit = min(cap // 2, 100 << 20)      # request <= 50% of physical VMEM
    budget = (limit * 3) // 4             # headroom for operands / compiler scratch
    return limit, budget


def _pick_tile_n(n_rows, t_cols, x_itemsize, out_itemsize, budget):
    """Largest 8-aligned row tile whose double-buffered, lane-PADDED in+out blocks fit."""
    if n_rows < 8:
        return max(int(n_rows), 1)        # block == full array rows (always legal)
    pad_t = _round_up(t_cols, _LANE)      # lane padding: T<128 still occupies 128 lanes
    bytes_per_row = 2 * pad_t * x_itemsize + 2 * pad_t * out_itemsize  # 2-deep in + out
    tile = max(8, min(MAX_TILE_N, (budget // bytes_per_row) // 8 * 8))
    if x_itemsize < 4 and tile >= 16:
        tile = tile // 16 * 16            # keep sub-32-bit sublane packing aligned
    return int(min(tile, (n_rows // 8) * 8))


def _stats_kernel(x_ref, w_ref, stats_ref, *, n_rows, tile_n, tiles_per_shard):
    """Pass 1: per-step sum / sum-of-squares of y = x @ W (bias omitted: cancels in BN)."""
    c = pl.program_id(0)                  # stats shard ("parallel": one per TC on v7x)
    t = pl.program_id(1)                  # row tile within the shard ("arbitrary")

    @pl.when(t == 0)
    def _():
        stats_ref[...] = jnp.zeros_like(stats_ref)

    y = jnp.dot(x_ref[...], w_ref[...], preferred_element_type=jnp.float32)  # (tile_n, H)

    # Zero rows past N: covers the ragged last tile (overhanging blocks contain
    # unspecified data) and shard/tile indices whose DMA block index was clamped.
    base = (c * tiles_per_shard + t) * tile_n
    row = jax.lax.broadcasted_iota(jnp.int32, (tile_n, 1), 0)
    y = jnp.where(base + row < n_rows, y, 0.0)

    # Single fused reduction of [y | y*y] -> (1, 2H) on the VPU/XLU, keeping the MXU
    # (busy with the main matmul) off the stats path.
    part = jnp.sum(jnp.concatenate([y, y * y], axis=-1), axis=0, keepdims=True)
    stats_ref[...] = stats_ref[...] + part[:, None, :]      # broadcast into the block


def _apply_kernel(x_ref, w_ref, scale_ref, shift_ref, seed_ref, out_ref,
                  *, window, tile_n, training, drop_p):
    """Pass 2: out = [ x[:, :W] | dropout(relu((x @ W) * scale + shift)) ], (tile_n, T)."""
    x = x_ref[...]
    y = jnp.dot(x, w_ref[...], preferred_element_type=jnp.float32)
    y = jnp.maximum(y * scale_ref[...] + shift_ref[...], 0.0)

    if training and drop_p > 0.0:
        # nn.Dropout(p) train mode: keep w.p. (1-p), scale kept values by 1/(1-p).
        # Counter-based integer hash of (global row, col, seed): identical results for
        # any tiling / any generation, and lowers on both real TPUs and the CPU
        # interpreter (no pltpu.prng_* dependency).
        # TODO(synk): distribution-equivalent only; not bit-exact with torch's RNG stream.
        gr = jax.lax.broadcasted_iota(jnp.int32, y.shape, 0) + pl.program_id(0) * tile_n
        gc = jax.lax.broadcasted_iota(jnp.int32, y.shape, 1)
        h = (gr.astype(jnp.uint32) * jnp.uint32(0x9E3779B1)
             ^ gc.astype(jnp.uint32) * jnp.uint32(0x85EBCA77)
             ^ seed_ref[0].astype(jnp.uint32) * jnp.uint32(0x27D4EB2F))
        h = h ^ (h >> 16)
        h = h * jnp.uint32(0x7FEB352D)
        h = h ^ (h >> 15)
        h = h * jnp.uint32(0x846CA68B)
        h = h ^ (h >> 16)
        u = (h >> 8).astype(jnp.int32).astype(jnp.float32) * jnp.float32(1.0 / (1 << 24))
        keep = u >= jnp.float32(drop_p)                 # P(keep) = 1-p; safe as p -> 1
        y = jnp.where(keep, y * jnp.float32(1.0 / max(1.0 - drop_p, 1e-20)), 0.0)

    # Fused pass-through: window columns come from the already-resident x block, so the
    # wrapper never does a separate (N, T)-sized concat (saves ~NT read + NT write).
    out_ref[...] = jnp.concatenate(
        [x[:, :window].astype(out_ref.dtype), y.astype(out_ref.dtype)], axis=-1)


def mlp_flat_forward(x_past, w, b, gamma, beta, *, window_size: int, horizon: int,
                     training: bool = False, dropout_p: float = 0.2, seed: int = 0):
    """Forward of MLPFlatModule (non-last-layer, 'bn' norm, train-mode batch statistics).

    x streams in its own dtype; pass bfloat16 x_past for ~2x less read traffic.
    Output dtype matches x_past; BN stats / folded scale & shift stay in float32.
    """
    B, C, T = x_past.shape
    assert T == window_size + horizon
    H = horizon
    N = B * C

    x2d = x_past.reshape(N, T)
    w_k = jnp.asarray(w, x2d.dtype).reshape(T, H)        # tiny; match x's MXU dtype
    gamma = jnp.asarray(gamma, jnp.float32).reshape(1, H)
    beta = jnp.asarray(beta, jnp.float32).reshape(1, H)
    # nn.Linear bias cancels exactly inside BatchNorm (mean subtraction): never streamed.
    del b
    # TODO(synk): BatchNorm1d running_mean/running_var buffers are not produced/updated
    # (they are not part of the returned forward value).

    vmem_limit, tile_budget = _vmem_config()
    itemsize = jnp.dtype(x2d.dtype).itemsize
    tile_n = _pick_tile_n(N, T, itemsize, itemsize, tile_budget)
    n_tiles = pl.cdiv(N, tile_n)
    num_shards = min(STATS_SHARDS, n_tiles)
    tiles_per_shard = pl.cdiv(n_tiles, num_shards)

    # ---- pass 1: batch statistics sum[y], sum[y^2] over the N = B*C rows -------------
    stats = pl.pallas_call(
        partial(_stats_kernel, n_rows=N, tile_n=tile_n, tiles_per_shard=tiles_per_shard),
        out_shape=jax.ShapeDtypeStruct((num_shards, 8, 2 * H), jnp.float32),
        grid=(num_shards, tiles_per_shard),
        in_specs=[
            # Clamp the nominal block index so shards past the last real tile issue an
            # in-bounds DMA; their rows are masked to zero inside the kernel.
            pl.BlockSpec((tile_n, T),
                         lambda c, t: (jnp.minimum(c * tiles_per_shard + t, n_tiles - 1), 0)),
            pl.BlockSpec((T, H), lambda c, t: (0, 0)),
        ],
        out_specs=pl.BlockSpec((1, 8, 2 * H), lambda c, t: (c, 0, 0)),
        compiler_params=pltpu.CompilerParams(
            dimension_semantics=("parallel", "arbitrary"),
            vmem_limit_bytes=vmem_limit),
    )(x2d, w_k)

    sums = jnp.sum(stats[:, 0, :], axis=0)               # combine per-shard partials
    mean = (sums[:H] / float(N)).reshape(1, H)
    # Single-pass, biased (train-mode torch) variance.  Bias-free y improves numerics;
    # E[y^2] - E[y]^2 can still cancel if |mean| >> std, the clamp guards the rsqrt.
    var = jnp.maximum((sums[H:] / float(N)).reshape(1, H) - mean * mean, 0.0)
    scale = gamma * jax.lax.rsqrt(var + BN_EPS)
    shift = beta - mean * scale                           # Linear bias already cancelled

    seed_arr = jnp.asarray([seed], jnp.int32)

    # ---- pass 2: lane-dense (N, T) output with the window pass-through fused in ------
    out2d = pl.pallas_call(
        partial(_apply_kernel, window=window_size, tile_n=tile_n,
                training=training, drop_p=float(dropout_p)),
        out_shape=jax.ShapeDtypeStruct((N, T), x2d.dtype),
        grid=(n_tiles,),
        in_specs=[
            pl.BlockSpec((tile_n, T), lambda i: (i, 0)),          # x row tile
            pl.BlockSpec((T, H), lambda i: (0, 0)),               # W (stored transposed)
            pl.BlockSpec((1, H), lambda i: (0, 0)),               # folded BN scale
            pl.BlockSpec((1, H), lambda i: (0, 0)),               # folded BN shift
            pl.BlockSpec(memory_space=pltpu.MemorySpace.SMEM),    # dropout seed
        ],
        out_specs=pl.BlockSpec((tile_n, T), lambda i: (i, 0)),
        compiler_params=pltpu.CompilerParams(
            dimension_semantics=("parallel",),
            vmem_limit_bytes=vmem_limit),
    )(x2d, w_k, scale, shift, seed_arr)

    return out2d.reshape(B, C, T)


if __name__ == "__main__":
    # Small shapes consistent with the module's forward: x_past is (B, C, W + H).
    B, C = 2, 4
    window_size, horizon = 16, 8
    T = window_size + horizon

    key = jax.random.PRNGKey(0)
    k1, k2, k3, k4, k5 = jax.random.split(key, 5)

    # Parameters per module __init__:
    #   nn.Linear(W + H, H) -> weight stored transposed (T, H), bias (H,)
    #   BatchNorm1d(H, affine=True) -> gamma (H,), beta (H,)
    x_past = jax.random.normal(k1, (B, C, T), jnp.float32)
    w = jax.random.normal(k2, (T, horizon), jnp.float32) / jnp.sqrt(float(T))
    b = 0.1 * jax.random.normal(k3, (1, horizon), jnp.float32)
    gamma = 1.0 + 0.1 * jax.random.normal(k4, (1, horizon), jnp.float32)
    beta = 0.1 * jax.random.normal(k5, (1, horizon), jnp.float32)

    # ---- eval-dropout (deterministic) forward vs pure-JAX f32 reference --------------
    out = jax.block_until_ready(
        mlp_flat_forward(x_past, w, b, gamma, beta,
                         window_size=window_size, horizon=horizon, training=False))

    x2d = x_past.reshape(-1, T)
    y = x2d @ w + b
    mean = y.mean(0, keepdims=True)
    var = ((y - mean) ** 2).mean(0, keepdims=True)
    ref_net = jnp.maximum((y - mean) / jnp.sqrt(var + BN_EPS) * gamma + beta, 0.0)
    ref = jnp.concatenate([x2d[:, :window_size], ref_net], -1).reshape(B, C, T)

    assert out.shape == (B, C, T) and out.dtype == jnp.float32
    assert jnp.array_equal(out[..., :window_size], x_past[..., :window_size]), \
        "window pass-through not exact"
    assert jnp.allclose(out, ref, atol=1e-4, rtol=1e-4), "mismatch vs f32 reference"

    # ---- train-mode dropout smoke test (distributional semantics) --------------------
    out_tr = jax.block_until_ready(
        mlp_flat_forward(x_past, w, b, gamma, beta,
                         window_size=window_size, horizon=horizon,
                         training=True, dropout_p=0.2, seed=123))
    assert jnp.array_equal(out_tr[..., :window_size], x_past[..., :window_size]), \
        "window pass-through changed under dropout"
    net_tr = out_tr[..., window_size:].reshape(-1, horizon)
    scaled = ref_net / 0.8
    dropout_ok = jnp.all((jnp.abs(net_tr) <= 1e-6) | (jnp.abs(net_tr - scaled) <= 1e-4))
    assert bool(dropout_ok), "dropout output not in {0, relu(bn(y))/(1-p)}"

    # ---- bf16 input streaming smoke test (native-dtype streaming path) ---------------
    x_bf = x_past.astype(jnp.bfloat16)
    out_bf = jax.block_until_ready(
        mlp_flat_forward(x_bf, w, b, gamma, beta,
                         window_size=window_size, horizon=horizon, training=False))
    assert out_bf.dtype == jnp.bfloat16
    assert jnp.array_equal(out_bf[..., :window_size], x_bf[..., :window_size])
    assert bool(jnp.all(jnp.isfinite(out_bf.astype(jnp.float32))))

    print("KERNEL_OK")
</pallas_src>

<mosaic_0001>
module attributes {stable_mosaic.version = 11 : i64} {
  func.func @_stats_kernel(%arg0: i32, %arg1: i32, %arg2: memref<8x24xf32, #tpu.memory_space<vmem>>, %arg3: memref<24x8xf32, #tpu.memory_space<vmem>>, %arg4: memref<1x8x16xf32, #tpu.memory_space<vmem>>) attributes {dimension_semantics = [#tpu.dimension_semantics<parallel>, #tpu.dimension_semantics<arbitrary>], iteration_bounds = array<i64: 1, 1>, scalar_prefetch = 0 : i64, scratch_operands = 0 : i64, tpu.core_type = #tpu.core_type<tc>, window_params = [{transform_indices = @transform_0, window_bounds = array<i64: 8, 24>}, {pipeline_mode = #tpu.pipeline_mode<synchronous>, transform_indices = @transform_1, window_bounds = array<i64: 24, 8>}, {transform_indices = @transform_2, window_bounds = array<i64: 1, 8, 16>}]} {
    %c0_i32 = arith.constant 0 : i32
    %0 = arith.cmpi eq, %arg1, %c0_i32 : i32
    %1 = arith.extui %0 : i1 to i32
    %c0_i32_0 = arith.constant 0 : i32
    %2 = arith.cmpi ne, %1, %c0_i32_0 : i32
    scf.if %2 {
      %cst_13 = arith.constant 0.000000e+00 : f32
      %27 = vector.broadcast %cst_13 : f32 to vector<1x8x16xf32>
      %c0_14 = arith.constant 0 : index
      %c0_15 = arith.constant 0 : index
      %c0_16 = arith.constant 0 : index
      %28 = vector.load %arg4[%c0_14, %c0_15, %c0_16] : memref<1x8x16xf32, #tpu.memory_space<vmem>>, vector<1x8x16xf32>
      tpu.vector_store %arg4[%c0_14, %c0_15, %c0_16], %27 {strides = array<i32>} : memref<1x8x16xf32, #tpu.memory_space<vmem>>, vector<1x8x16xf32>,
    } else {
    }
    %c0 = arith.constant 0 : index
    %c0_1 = arith.constant 0 : index
    %3 = vector.load %arg2[%c0, %c0_1] : memref<8x24xf32, #tpu.memory_space<vmem>>, vector<8x24xf32>
    %c0_2 = arith.constant 0 : index
    %c0_3 = arith.constant 0 : index
    %4 = vector.load %arg3[%c0_2, %c0_3] : memref<24x8xf32, #tpu.memory_space<vmem>>, vector<24x8xf32>
    %cst = arith.constant dense<0.000000e+00> : vector<8x8xf32>
    %5 = tpu.matmul %3, %4, %cst {dimension_numbers = #tpu.dot_dimension_numbers<[1], [0], [0], [1], [0, 0, 1, 1], [], []>} : vector<8x24xf32>, vector<24x8xf32>, vector<8x8xf32> -> vector<8x8xf32>
    %c1_i32 = arith.constant 1 : i32
    %6 = arith.muli %arg0, %c1_i32 : i32
    %7 = arith.addi %6, %arg1 : i32
    %c8_i32 = arith.constant 8 : i32
    %8 = arith.muli %7, %c8_i32 : i32
    %9 = tpu.iota {dimensions = array<i32: 0>} : vector<8x1xi32>
    %10 = vector.broadcast %8 : i32 to vector<8x1xi32>
    %11 = arith.addi %10, %9 : vector<8x1xi32>
    %c8_i32_4 = arith.constant 8 : i32
    %12 = vector.broadcast %c8_i32_4 : i32 to vector<8x1xi32>
    %13 = arith.cmpi slt, %11, %12 : vector<8x1xi32>
    %cst_5 = arith.constant 0.000000e+00 : f32
    %14 = vector.shape_cast %13 : vector<8x1xi1> to vector<8x1xi1>
    %15 = vector.broadcast %14 : vector<8x1xi1> to vector<8x8xi1>
    %16 = vector.broadcast %cst_5 : f32 to vector<8x8xf32>
    %17 = arith.select %15, %5, %16 : vector<8x8xi1>, vector<8x8xf32>
    %18 = arith.mulf %17, %17 : vector<8x8xf32>
    %19 = tpu.concatenate %17, %18 in 1 : vector<8x8xf32>, vector<8x8xf32> -> vector<8x16xf32>
    %cst_6 = arith.constant dense<0.000000e+00> : vector<16xf32>
    %20 = vector.multi_reduction <add>, %19, %cst_6 [0] : vector<8x16xf32> to vector<16xf32>
    %21 = vector.shape_cast %20 : vector<16xf32> to vector<1x16xf32>
    %c0_7 = arith.constant 0 : index
    %c0_8 = arith.constant 0 : index
    %c0_9 = arith.constant 0 : index
    %22 = vector.load %arg4[%c0_7, %c0_8, %c0_9] : memref<1x8x16xf32, #tpu.memory_space<vmem>>, vector<1x8x16xf32>
    %23 = vector.shape_cast %21 : vector<1x16xf32> to vector<1x1x16xf32>
    %24 = vector.broadcast %23 : vector<1x1x16xf32> to vector<1x8x16xf32>
    %25 = arith.addf %22, %24 : vector<1x8x16xf32>
    %c0_10 = arith.constant 0 : index
    %c0_11 = arith.constant 0 : index
    %c0_12 = arith.constant 0 : index
    %26 = vector.load %arg4[%c0_10, %c0_11, %c0_12] : memref<1x8x16xf32, #tpu.memory_space<vmem>>, vector<1x8x16xf32>
    tpu.vector_store %arg4[%c0_10, %c0_11, %c0_12], %25 {strides = array<i32>} : memref<1x8x16xf32, #tpu.memory_space<vmem>>, vector<1x8x16xf32>,
    return
  }
  func.func @transform_0(%arg0: i32, %arg1: i32) -> (i32, i32) {
    %c1_i32 = arith.constant 1 : i32
    %0 = arith.muli %arg0, %c1_i32 : i32
    %1 = arith.addi %0, %arg1 : i32
    %c0_i32 = arith.constant 0 : i32
    %2 = arith.minsi %1, %c0_i32 : i32
    %c0_i32_0 = arith.constant 0 : i32
    %c0_i32_1 = arith.constant 0 : i32
    return %2, %c0_i32_0 : i32, i32
  }
  func.func @transform_1(%arg0: i32, %arg1: i32) -> (i32, i32) {
    %c0_i32 = arith.constant 0 : i32
    %c0_i32_0 = arith.constant 0 : i32
    %c0_i32_1 = arith.constant 0 : i32
    return %c0_i32, %c0_i32_0 : i32, i32
  }
  func.func @transform_2(%arg0: i32, %arg1: i32) -> (i32, i32, i32) {
    %c0_i32 = arith.constant 0 : i32
    %c0_i32_0 = arith.constant 0 : i32
    %c0_i32_1 = arith.constant 0 : i32
    return %arg0, %c0_i32, %c0_i32_0 : i32, i32, i32
  }
}

</mosaic_0001>

<bundles_post_ra>
// kernel: tpu_custom_call.1
= control target key start
LH: loop header
LB: loop body
LE: loop exit
PB: predicated region body
PF: predicated region fallthrough
CT: control target
= control target key end

     0   :  { %vm43_vm0 = vcmask 130048   ;;  %v217_v2 = vmov 0.0|0.0   ;;  %v218_v4 = vmov 0.0   ;;  %s264_s0 = inlined_call_operand.vmem [shape: f32[8,24], index: 0, kind: input, shape index: {}]   ;;  %s265_s1 = inlined_call_operand.vmem [shape: f32[24,8], index: 1, kind: input, shape index: {}]   ;;  %s266_s2 = inlined_call_operand.hbm [shape: f32[1,8,16], index: 2, kind: output, shape index: {}]  }
   0x1   :  { %v46_v0 = vld [vmem:[%s265_s1] sm:$0xff]  ;;  %v47_v1 = vld [vmem:[%s265_s1 + $0x8] sm:$0xff]  ;;  %185 = vmatprep.subr.bf16.mxu0 %v217_v2  ;;  %44 = vst.msk [vmem:[#allocation2] sm:$0xff] %vm43_vm0, %v218_v4 }
   0x2   :  { %v186_v3 = vpack.c.bf16 %v47_v1, %v46_v0 }
   0x3   :  { %7 = vsyncpa [#allocation3], 0  ;;  %vm219_vm1 = vmmov 0   ;;  %v48_v5 = vld [vmem:[%s265_s1 + $0x10] sm:$0xff]  ;;  %v45_v6 = vld [vmem:[%s264_s0] sm:$0xff]  ;;  %vm49_vm2 = vcmask 195584  }
   0x4   :  { %182 = vmatprep.mubr.msk.f32.mxu0 %vm219_vm1, %v218_v4  ;;  %187 = vmatpush3.bf16.msra.mxu0 %v186_v3  ;;  %s220_s17 = smov 8   ;;  %vm138_vm3 = vcmask 64512   ;;  %s221_s0 = smov [#allocation2]  }
   0x5   :  { %180 = vmatprep.subr.mxu0 %v218_v4  ;;  %s157_s1 = sshll.u32 %s221_s0, 4  ;;  %s158_s1 = int_to_ptr.vmem [resolvable:$true] %s157_s1 }
   0x6   :  { %s193_s18 = scalar_lea.vmem %s158_s1, 128  ;;  %p198_p1 = scmp.lt.s32.totalorder %s158_s1, %s158_s1 }
   0x7   :  { %p194_p0 = scmp.ne.s32.totalorder %s158_s1, %s193_s18  ;;  %p199_p2 = scmp.lt.s32.totalorder %s193_s18, %s193_s18 }
   0x8   :  { %181 = vmatpush3.msra.mxu0 %v48_v5  ;;  %v148_v18 = vld [vmem:[#allocation2] sm:$0xff] }
   0x9   :  { %183 = vmatmul.mubr.msk.f32.vlgmr.msra.gmra.mrb[0].mxu0 %vm49_vm2, %v45_v6  ;;  %p200_p3 = por %p199_p2, %p198_p1 }
   0xb   :  { %p201_p4 = pnand %p200_p3, %p194_p0 }
  0xdc   :  { %v119_v7 = vpop.f32.mrb[0].mxu0 }
  0xdd   :  { %v184_v8 = vpop.f32.mrb[1].mxu0  ;;  %v133_v9 = vmul.f32 %v119_v7, %v119_v7 }
  0xdf   :  { %135 = vrot.lane.b32.xlu0 %v133_v9, %s220_s17 }
 0x151   :  { %v136_v10 = vpop.permute.xlu0 %135 }
 0x152   :  { %v139_v11 = vsel %vm138_vm3, %v119_v7, %v136_v10 }
 0x153   :  { %v141_v12 = vsel %vm43_vm0, %v139_v11, 0.0 }
 0x154   :  { %v142_v13 = vrot.slane %v141_v12, 4 }
 0x156   :  { %v143_v14 = vadd.f32 %v142_v13, %v141_v12 }
 0x158   :  { %v144_v15 = vrot.slane %v143_v14, 2 }
 0x15a   :  { %v145_v16 = vadd.f32 %v144_v15, %v143_v14 }
 0x15c   :  { %v146_v17 = vrot.slane %v145_v16, 1 }
 0x15e   :  { %v147_v19 = vadd.f32 %v146_v17, %v145_v16 }
 0x160   :  { %v149_v20 = vadd.f32 %v148_v18, %v147_v19 }
 0x162   :  { %150 = vst.msk [vmem:[#allocation2] sm:$0xff] %vm43_vm0, %v149_v20 }
 0x163   :  { %204 = shalt.err (!%p201_p4)
}
 0x164   :  { %s205_s21 = scalar_lea.hbm %s266_s2, 128 }
 0x165   :  { %p206_p5 = scmp.ne.s32.totalorder %s266_s2, %s205_s21  ;;  %p209_p6 = scmp.lt.u32.totalorder %s205_s21, %s266_s2 }
 0x167   :  { %p211_p7 = pnand %p209_p6, %p206_p5 }
 0x169   :  { %214 = shalt.err (!%p211_p7)
}
 0x16a   :  { %160 = dma.vmem_to_hbm [thread:$0]  %s158_s1, 128, %s266_s2, [#allocation3]  }
 0x16b   :  { %215 = dma.done.wait [#allocation3], 128  }
 0x16c   :  { %216 = vsyncadd [#allocation3], 4294967168 }
 0x16d   :  { %164 = vsyncpa [#allocation3], 1 }

</bundles_post_ra>
